<compile_context>
chip_gen: v7x
topology: tpu7x:2x2x1
jax: 0.10.0
libtpu: 0.0.40
codegen_flags: <defaults>
</compile_context>

<pallas_src>
import jax
import jax.numpy as jnp
import numpy as np
from jax.experimental import pallas as pl
from jax.experimental.pallas import tpu as pltpu

EPS = 1e-5

# Packed parameter slab layout: (112, 128) f32, zero padded.
#   rows   0..7   : W1' (8  x 64 in cols 0..63)   -- BN affine folded in
#   rows   8..71  : W2  (64 x 32 in cols 0..31)
#   rows  72..103 : W3  (32 x 2  in cols 0..1)
#   row  104      : b1' (64 wide)
#   row  105      : b2  (32 wide)
#   row  106      : b3  (2 wide)
#   rows 107..111 : zero padding (sublane multiple of 8)
SLAB_ROWS = 112


def mlp_kernel(x_ref, slab_hbm, o_ref, w_ref, dma_sem):
    # --- kick off the parameter-slab DMA (HBM -> VMEM scratch) immediately ---
    slab_cp = pltpu.make_async_copy(slab_hbm, w_ref, dma_sem)
    slab_cp.start()

    # --- BatchNorm1d(8): batch statistics (affine folded into W1/b1).
    # The two reductions are independent (var = E[x^2] - mean^2), so they do
    # not serialize two XLU round-trips, and they overlap the slab DMA.
    x = x_ref[...].astype(jnp.float32)                        # (B, 8)
    inv_b = jnp.float32(1.0 / x.shape[0])
    s1 = jnp.sum(x, axis=0, keepdims=True)                    # (1, 8)
    s2 = jnp.sum(x * x, axis=0, keepdims=True)                # (1, 8)
    mean = s1 * inv_b
    var = s2 * inv_b - mean * mean
    xn = (x - mean) * jax.lax.rsqrt(var + EPS)                # (B, 8)

    # --- weights are needed now: wait for the slab ---
    slab_cp.wait()

    # Static, sublane-aligned views into the packed slab.
    w1 = w_ref[0:8, :]                                        # (8,  128)
    w2 = w_ref[8:72, :]                                       # (64, 128)
    w3 = w_ref[72:104, :]                                     # (32, 128)
    b1 = w_ref[104:105, :]                                    # (1, 128)
    b2 = w_ref[105:106, :]                                    # (1, 128)
    b3 = w_ref[106:107, :]                                    # (1, 128)

    # --- fc_1 + tanh (lane-dense 128-wide output; padded cols stay 0) ---
    h1 = jnp.tanh(jnp.dot(xn, w1, preferred_element_type=jnp.float32) + b1)
    # --- fc_2 + tanh (true-K LHS slice: only 64 RHS rows through the MXU) ---
    h2 = jnp.tanh(jnp.dot(h1[:, :64], w2,
                          preferred_element_type=jnp.float32) + b2)
    # --- fc_3 (true-K LHS slice: 32 RHS rows) ---
    out = jnp.dot(h2[:, :32], w3, preferred_element_type=jnp.float32) + b3

    o_ref[...] = out[:, 0:2].astype(o_ref.dtype)              # (B, 2)


def pack_params(params):
    """Fold BN affine into layer 1 and pack everything into one (112,128) slab.

    Host-side, one-time step: call once when parameters are loaded/updated,
    never inside the per-step hot path.
    """
    gamma, beta, w1, b1, w2, b2, w3, b3 = (np.asarray(p, np.float32) for p in params)
    # Fold BatchNorm affine: y = (xn*gamma + beta) @ W1 + b1
    #                          = xn @ (diag(gamma) @ W1) + (beta @ W1 + b1)
    w1f = gamma.reshape(8, 1) * w1                            # (8, 64)
    b1f = beta.reshape(1, 8) @ w1 + b1                        # (1, 64)

    slab = np.zeros((SLAB_ROWS, 128), np.float32)
    slab[0:8, 0:64] = w1f
    slab[8:72, 0:32] = w2
    slab[72:104, 0:2] = w3
    slab[104, 0:64] = b1f.reshape(64)
    slab[105, 0:32] = b2.reshape(32)
    slab[106, 0:2] = b3.reshape(2)
    return jnp.asarray(slab)                                  # device constant


def model_forward(x, packed_slab):
    B = x.shape[0]
    return pl.pallas_call(
        mlp_kernel,
        out_shape=jax.ShapeDtypeStruct((B, 2), jnp.float32),
        in_specs=[
            pl.BlockSpec(memory_space=pltpu.VMEM),            # x: 256 B, instant
            pl.BlockSpec(memory_space=pl.ANY),                # slab: manual DMA
        ],
        out_specs=pl.BlockSpec(memory_space=pltpu.VMEM),
        scratch_shapes=[
            pltpu.VMEM((SLAB_ROWS, 128), jnp.float32),        # slab landing buffer
            pltpu.SemaphoreType.DMA(()),                      # slab DMA semaphore
        ],
    )(x, packed_slab)


def init_params(key):
    # Deterministic init mimicking PyTorch defaults:
    # Linear: U(-1/sqrt(fan_in), 1/sqrt(fan_in)); BatchNorm: gamma=1, beta=0.
    def linear(key, fan_in, fan_out):
        kw, kb = jax.random.split(key)
        bound = 1.0 / jnp.sqrt(fan_in)
        # Stored pre-transposed as (in, out) so the forward does x @ W directly.
        w = jax.random.uniform(kw, (fan_in, fan_out), jnp.float32, -bound, bound)
        b = jax.random.uniform(kb, (1, fan_out), jnp.float32, -bound, bound)
        return w, b

    k1, k2, k3 = jax.random.split(key, 3)
    gamma = jnp.ones((1, 8), jnp.float32)
    beta = jnp.zeros((1, 8), jnp.float32)
    w1, b1 = linear(k1, 8, 64)
    w2, b2 = linear(k2, 64, 32)
    w3, b3 = linear(k3, 32, 2)
    return gamma, beta, w1, b1, w2, b2, w3, b3


def reference_forward(x, params):
    gamma, beta, w1, b1, w2, b2, w3, b3 = params
    mean = jnp.mean(x, axis=0, keepdims=True)
    var = jnp.mean((x - mean) ** 2, axis=0, keepdims=True)
    xn = (x - mean) / jnp.sqrt(var + EPS) * gamma + beta
    h1 = jnp.tanh(xn @ w1 + b1)
    h2 = jnp.tanh(h1 @ w2 + b2)
    return h2 @ w3 + b3


if __name__ == "__main__":
    key = jax.random.PRNGKey(0)
    kx, kp = jax.random.split(key)
    B = 8
    x = jax.random.normal(kx, (B, 8), jnp.float32)
    params = init_params(kp)
    slab = pack_params(params)            # packed once, host-side

    out = model_forward(x, slab)
    out = jax.block_until_ready(out)

    ref = reference_forward(x, params)
    assert out.shape == (B, 2)
    assert jnp.allclose(out, ref, atol=1e-4, rtol=1e-4), (out, ref)
    print("KERNEL_OK")
</pallas_src>

<mosaic_0001>
module attributes {stable_mosaic.version = 11 : i64} {
  func.func @mlp_kernel(%arg0: memref<8x8xf32, #tpu.memory_space<vmem>>, %arg1: memref<112x128xf32, #tpu.memory_space<any>>, %arg2: memref<8x2xf32, #tpu.memory_space<vmem>>, %arg3: memref<112x128xf32, #tpu.memory_space<vmem>>, %arg4: memref<!tpu.dma_semaphore, #tpu.memory_space<semaphore_mem>>) attributes {dimension_semantics = [], scalar_prefetch = 0 : i64, scratch_operands = 2 : i64, tpu.core_type = #tpu.core_type<tc>} {
    tpu.enqueue_dma source(%arg1 : memref<112x128xf32, #tpu.memory_space<any>>) target(%arg3 : memref<112x128xf32, #tpu.memory_space<vmem>>) target_semaphore(%arg4 : memref<!tpu.dma_semaphore, #tpu.memory_space<semaphore_mem>>)
    %c0 = arith.constant 0 : index
    %c0_0 = arith.constant 0 : index
    %0 = vector.load %arg0[%c0, %c0_0] : memref<8x8xf32, #tpu.memory_space<vmem>>, vector<8x8xf32>
    %cst = arith.constant dense<0.000000e+00> : vector<8xf32>
    %1 = vector.multi_reduction <add>, %0, %cst [0] : vector<8x8xf32> to vector<8xf32>
    %2 = vector.shape_cast %1 : vector<8xf32> to vector<1x8xf32>
    %3 = arith.mulf %0, %0 : vector<8x8xf32>
    %cst_1 = arith.constant dense<0.000000e+00> : vector<8xf32>
    %4 = vector.multi_reduction <add>, %3, %cst_1 [0] : vector<8x8xf32> to vector<8xf32>
    %5 = vector.shape_cast %4 : vector<8xf32> to vector<1x8xf32>
    %cst_2 = arith.constant 1.250000e-01 : f32
    %6 = vector.broadcast %cst_2 : f32 to vector<1x8xf32>
    %7 = arith.mulf %2, %6 : vector<1x8xf32>
    %cst_3 = arith.constant 1.250000e-01 : f32
    %8 = vector.broadcast %cst_3 : f32 to vector<1x8xf32>
    %9 = arith.mulf %5, %8 : vector<1x8xf32>
    %10 = arith.mulf %7, %7 : vector<1x8xf32>
    %11 = arith.subf %9, %10 : vector<1x8xf32>
    %12 = vector.broadcast %7 : vector<1x8xf32> to vector<8x8xf32>
    %13 = arith.subf %0, %12 : vector<8x8xf32>
    %cst_4 = arith.constant 9.99999974E-6 : f32
    %14 = vector.broadcast %cst_4 : f32 to vector<1x8xf32>
    %15 = arith.addf %11, %14 : vector<1x8xf32>
    %16 = math.rsqrt %15 : vector<1x8xf32>
    %17 = vector.broadcast %16 : vector<1x8xf32> to vector<8x8xf32>
    %18 = arith.mulf %13, %17 : vector<8x8xf32>
    tpu.wait_dma2 semaphore(%arg4 : memref<!tpu.dma_semaphore, #tpu.memory_space<semaphore_mem>>) src(%arg1 : memref<112x128xf32, #tpu.memory_space<any>>) dst(%arg3 : memref<112x128xf32, #tpu.memory_space<vmem>>)
    %c0_5 = arith.constant 0 : index
    %c0_6 = arith.constant 0 : index
    %19 = vector.load %arg3[%c0_5, %c0_6] : memref<112x128xf32, #tpu.memory_space<vmem>>, vector<8x128xf32>
    %c8 = arith.constant 8 : index
    %c0_7 = arith.constant 0 : index
    %20 = vector.load %arg3[%c8, %c0_7] : memref<112x128xf32, #tpu.memory_space<vmem>>, vector<64x128xf32>
    %c72 = arith.constant 72 : index
    %c0_8 = arith.constant 0 : index
    %21 = vector.load %arg3[%c72, %c0_8] : memref<112x128xf32, #tpu.memory_space<vmem>>, vector<32x128xf32>
    %c104 = arith.constant 104 : index
    %c0_9 = arith.constant 0 : index
    %22 = vector.load %arg3[%c104, %c0_9] : memref<112x128xf32, #tpu.memory_space<vmem>>, vector<1x128xf32>
    %c105 = arith.constant 105 : index
    %c0_10 = arith.constant 0 : index
    %23 = vector.load %arg3[%c105, %c0_10] : memref<112x128xf32, #tpu.memory_space<vmem>>, vector<1x128xf32>
    %c106 = arith.constant 106 : index
    %c0_11 = arith.constant 0 : index
    %24 = vector.load %arg3[%c106, %c0_11] : memref<112x128xf32, #tpu.memory_space<vmem>>, vector<1x128xf32>
    %cst_12 = arith.constant dense<0.000000e+00> : vector<8x128xf32>
    %25 = tpu.matmul %18, %19, %cst_12 {dimension_numbers = #tpu.dot_dimension_numbers<[1], [0], [0], [1], [0, 0, 1, 1], [], []>} : vector<8x8xf32>, vector<8x128xf32>, vector<8x128xf32> -> vector<8x128xf32>
    %26 = vector.broadcast %22 : vector<1x128xf32> to vector<8x128xf32>
    %27 = arith.addf %25, %26 : vector<8x128xf32>
    %28 = math.tanh %27 : vector<8x128xf32>
    %29 = vector.extract_strided_slice %28 {offsets = [0, 0], sizes = [8, 64], strides = [1, 1]} : vector<8x128xf32> to vector<8x64xf32>
    %cst_13 = arith.constant dense<0.000000e+00> : vector<8x128xf32>
    %30 = tpu.matmul %29, %20, %cst_13 {dimension_numbers = #tpu.dot_dimension_numbers<[1], [0], [0], [1], [0, 0, 1, 1], [], []>} : vector<8x64xf32>, vector<64x128xf32>, vector<8x128xf32> -> vector<8x128xf32>
    %31 = vector.broadcast %23 : vector<1x128xf32> to vector<8x128xf32>
    %32 = arith.addf %30, %31 : vector<8x128xf32>
    %33 = math.tanh %32 : vector<8x128xf32>
    %34 = vector.extract_strided_slice %33 {offsets = [0, 0], sizes = [8, 32], strides = [1, 1]} : vector<8x128xf32> to vector<8x32xf32>
    %cst_14 = arith.constant dense<0.000000e+00> : vector<8x128xf32>
    %35 = tpu.matmul %34, %21, %cst_14 {dimension_numbers = #tpu.dot_dimension_numbers<[1], [0], [0], [1], [0, 0, 1, 1], [], []>} : vector<8x32xf32>, vector<32x128xf32>, vector<8x128xf32> -> vector<8x128xf32>
    %36 = vector.broadcast %24 : vector<1x128xf32> to vector<8x128xf32>
    %37 = arith.addf %35, %36 : vector<8x128xf32>
    %38 = vector.extract_strided_slice %37 {offsets = [0, 0], sizes = [8, 2], strides = [1, 1]} : vector<8x128xf32> to vector<8x2xf32>
    %c0_15 = arith.constant 0 : index
    %c0_16 = arith.constant 0 : index
    %39 = vector.load %arg2[%c0_15, %c0_16] : memref<8x2xf32, #tpu.memory_space<vmem>>, vector<8x2xf32>
    tpu.vector_store %arg2[%c0_15, %c0_16], %38 {strides = array<i32>} : memref<8x2xf32, #tpu.memory_space<vmem>>, vector<8x2xf32>,
    return
  }
}

</mosaic_0001>

<bundles_post_ra>
// kernel: tpu_custom_call.1
= control target key start
LH: loop header
LB: loop body
LE: loop exit
PB: predicated region body
PF: predicated region fallthrough
CT: control target
= control target key end

     0   :  { %7 = vsyncpa [#allocation5], 0  ;;  %s459_s9 = smov [#allocation4]   ;;  %s509_s0 = inlined_call_operand.hbm [shape: f32[8,8], index: 0, kind: input, shape index: {}]   ;;  %s510_s1 = inlined_call_operand.hbm [shape: f32[112,128], index: 1, kind: input, shape index: {}]   ;;  %s511_s2 = inlined_call_operand.vmem [shape: f32[8,2], index: 2, kind: output, shape index: {}]  }
   0x1   :  { %s14_s10 = sshll.u32 %s459_s9, 4  ;;  %s411_s13 = scalar_lea.hbm %s509_s0, 128  ;;  %s15_s10 = int_to_ptr.vmem [resolvable:$true] %s14_s10 }
   0x2   :  { %p412_p0 = scmp.ne.s32.totalorder %s509_s0, %s411_s13  ;;  %p415_p1 = scmp.lt.u32.totalorder %s411_s13, %s509_s0 }
   0x4   :  { %p417_p2 = pnand %p415_p1, %p412_p0 }
   0x6   :  { %420 = shalt.err (!%p417_p2)
}
   0x7   :  { %s421_s18 = scalar_lea.vmem %s15_s10, 128  ;;  %p426_p4 = scmp.lt.s32.totalorder %s15_s10, %s15_s10 }
   0x8   :  { %p422_p3 = scmp.ne.s32.totalorder %s15_s10, %s421_s18  ;;  %p427_p5 = scmp.lt.s32.totalorder %s421_s18, %s421_s18 }
   0xa   :  { %p428_p6 = por %p427_p5, %p426_p4 }
   0xc   :  { %p429_p7 = pnand %p428_p6, %p422_p3 }
   0xe   :  { %432 = shalt.err (!%p429_p7)
}
   0xf   :  { %17 = dma.hbm_to_vmem [thread:$0]  %s509_s0, 128, %s15_s10, [#allocation5]  }
  0x10   :  { %455 = dma.done.wait [#allocation5], 128  }
  0x11   :  { %456 = vsyncadd [#allocation5], 4294967168  ;;  %s460_s21 = smov [#allocation2]   ;;  %s433_s25 = scalar_lea.hbm %s510_s1, 1792 }
  0x12   :  { %s28_s22 = sshll.u32 %s460_s21, 4  ;;  %p434_p8 = scmp.ne.s32.totalorder %s510_s1, %s433_s25  ;;  %s29_s22 = int_to_ptr.vmem [resolvable:$true] %s28_s22 }
  0x13   :  { %p437_p9 = scmp.lt.u32.totalorder %s433_s25, %s510_s1 }
  0x15   :  { %p439_p10 = pnand %p437_p9, %p434_p8 }
  0x17   :  { %442 = shalt.err (!%p439_p10)  }
  0x18   :  { %s443_s0 = scalar_lea.vmem %s29_s22, 1792  ;;  %p448_p12 = scmp.lt.s32.totalorder %s29_s22, %s29_s22 }
  0x19   :  { %p444_p11 = scmp.ne.s32.totalorder %s29_s22, %s443_s0  ;;  %p449_p13 = scmp.lt.s32.totalorder %s443_s0, %s443_s0 }
  0x1b   :  { %p450_p0 = por %p449_p13, %p448_p12 }
  0x1d   :  { %p451_p1 = pnand %p450_p0, %p444_p11 }
  0x1f   :  { %454 = shalt.err (!%p451_p1)  }
  0x20   :  { %31 = dma.hbm_to_vmem [thread:$0]  %s510_s1, 1792, %s29_s22, [#allocation3]  ;;  %vm33_vm0 = vcmask 64512   ;;  %v32_v0 = vld [vmem:[#allocation4] sm:$0xff] }
  0x21   :  { %v34_v1 = vsel %vm33_vm0, %v32_v0, 0.0  ;;  %v41_v2 = vmul.f32 %v32_v0, %v32_v0 }
  0x22   :  { %v35_v3 = vrot.slane %v34_v1, 4 }
  0x23   :  { %v42_v4 = vsel %vm33_vm0, %v41_v2, 0.0 }
  0x24   :  { %v36_v5 = vadd.f32 %v35_v3, %v34_v1  ;;  %v43_v6 = vrot.slane %v42_v4, 4 }
  0x26   :  { %v37_v7 = vrot.slane %v36_v5, 2  ;;  %v44_v8 = vadd.f32 %v43_v6, %v42_v4 }
  0x28   :  { %v38_v9 = vadd.f32 %v37_v7, %v36_v5  ;;  %v45_v10 = vrot.slane %v44_v8, 2 }
  0x2a   :  { %v39_v11 = vrot.slane %v38_v9, 1  ;;  %v46_v12 = vadd.f32 %v45_v10, %v44_v8 }
  0x2c   :  { %v40_v13 = vadd.f32 %v39_v11, %v38_v9  ;;  %v47_v14 = vrot.slane %v46_v12, 1 }
  0x2e   :  { %v48_v15 = vadd.f32 %v47_v14, %v46_v12  ;;  %v49_v16 = vmul.f32 0.125, %v40_v13 }
  0x30   :  { %v50_v17 = vmul.f32 0.125, %v48_v15  ;;  %v51_v18 = vmul.f32 %v49_v16, %v49_v16  ;;  %v53_v21 = vsub.f32 %v32_v0, %v49_v16 }
  0x32   :  { %v52_v19 = vsub.f32 %v50_v17, %v51_v18 }
  0x34   :  { %v54_v20 = vadd.f32 1e-05, %v52_v19 }
  0x36   :  { %405 = vrsqrt.f32 %v54_v20 }
  0x40   :  { %v406_v22 = vpop.eup %405 }
  0x41   :  { %v56_v23 = vmul.f32 %v406_v22, %v53_v21 }
  0x42   :  { %457 = dma.done.wait [#allocation3], 1792 }
  0x43   :  { %458 = vsyncadd [#allocation3], 4294965504  ;;  %v461_v24 = vmov 0.0   ;;  %vm462_vm1 = vmmov 0   ;;  %v463_v25 = vmov 0.0|0.0   ;;  %v60_v26 = vld [vmem:[#allocation2] sm:$0xff] }
  0x44   :  { %347 = vmatprep.subr.mxu0 %v461_v24  ;;  %349 = vmatprep.mubr.msk.f32.mxu0 %vm462_vm1, %v461_v24  ;;  %v61_v27 = vld [vmem:[#allocation2 + $0x8] sm:$0xff]  ;;  %v62_v28 = vld [vmem:[#allocation2 + $0x10] sm:$0xff]  ;;  %v63_v30 = vld [vmem:[#allocation2 + $0x18] sm:$0xff]  ;;  %vm158_vm2 = vcmask 523264   ;;  %vm237_vm3 = vcmask 261120   ;;  %vm311_vm4 = vcmask 15360  }
  0x45   :  { %382 = vmatprep.subr.bf16.mxu1 %v463_v25  ;;  %368 = vmatprep.mubr.msk.f32.mxu1 %vm462_vm1, %v461_v24  ;;  %v383_v29 = vpack.c.bf16 %v62_v28, %v61_v27  ;;  %v64_v31 = vld [vmem:[#allocation2 + $0x20] sm:$0xff]  ;;  %v65_v33 = vld [vmem:[#allocation2 + $0x28] sm:$0xff]  ;;  %v66_v34 = vld [vmem:[#allocation2 + $0x30] sm:$0xff] }
  0x46   :  { %348 = vmatpush3.msra.mxu0 %v60_v26  ;;  %v386_v32 = vpack.c.bf16 %v64_v31, %v63_v30  ;;  %v389_v35 = vpack.c.bf16 %v66_v34, %v65_v33  ;;  %v67_v36 = vld [vmem:[#allocation2 + $0x38] sm:$0xff]  ;;  %v68_v37 = vld [vmem:[#allocation2 + $0x40] sm:$0xff]  ;;  %v324_v39 = vld [vmem:[#allocation2 + $0x68] ss:$0 sm:$0xff] }
  0x47   :  { %350 = vmatmul.mubr.msk.f32.vlgmr.msra.gmra.mrb[0].mxu0 %vm33_vm0, %v56_v23  ;;  %394 = vmatprep.subr.bf16.mxu0 %v463_v25  ;;  %v392_v38 = vpack.c.bf16 %v68_v37, %v67_v36  ;;  %v69_v44 = vld [vmem:[#allocation2 + $0x48] sm:$0xff]  ;;  %v70_v45 = vld [vmem:[#allocation2 + $0x50] sm:$0xff]  ;;  %v71_v46 = vld [vmem:[#allocation2 + $0x58] sm:$0xff] }
  0x48   :  { %384 = vmatpush3.bf16.msra.mxu1 %v383_v29  ;;  %379 = vmatprep.mubr.msk.f32.mxu0 %vm462_vm1, %v461_v24  ;;  %v395_v47 = vpack.c.bf16 %v70_v45, %v69_v44  ;;  %v72_v48 = vld [vmem:[#allocation2 + $0x60] sm:$0xff]  ;;  %v326_v50 = vld [vmem:[#allocation2 + $0x69] ss:$0 sm:$0xff]  ;;  %v328_v55 = vld [vmem:[#allocation2 + $0x6a] ss:$0 sm:$0xff] }
  0x49   :  { %385 = vmatprep.subr.bf16.mxu1 %v463_v25  ;;  %v398_v49 = vpack.c.bf16 %v72_v48, %v71_v46 }
  0x4a   :  { %396 = vmatpush3.bf16.msra.mxu0 %v395_v47 }
  0x4b   :  { %397 = vmatprep.subr.bf16.mxu0 %v463_v25 }
  0x4c   :  { %387 = vmatpush3.bf16.msra.mxu1 %v386_v32 }
  0x4d   :  { %388 = vmatprep.subr.bf16.mxu1 %v463_v25 }
  0x4e   :  { %399 = vmatpush3.bf16.msra.mxu0 %v398_v49 }
  0x50   :  { %390 = vmatpush3.bf16.msra.mxu1 %v389_v35 }
  0x51   :  { %391 = vmatprep.subr.bf16.mxu1 %v463_v25 }
  0x54   :  { %393 = vmatpush3.bf16.msra.mxu1 %v392_v38 }
 0x11a   :  { %v149_v40 = vpop.f32.mrb[0].mxu0 }
 0x11b   :  { %v150_v41 = vadd.f32 %v324_v39, %v149_v40  ;;  %v351_v42 = vpop.f32.mrb[1].mxu0 }
 0x11d   :  { %407 = vtanh.f32 %v150_v41 }
 0x127   :  { %v408_v43 = vpop.eup %407 }
 0x128   :  { %369 = vmatmul.mubr.msk.f32.vlgmr.msra.gmra.mrb[0].mxu1 %vm158_vm2, %v408_v43 }
 0x1fb   :  { %v228_v51 = vpop.f32.mrb[0].mxu1 }
 0x1fc   :  { %v229_v52 = vadd.f32 %v326_v50, %v228_v51  ;;  %v370_v53 = vpop.f32.mrb[1].mxu1 }
 0x1fe   :  { %409 = vtanh.f32 %v229_v52 }
 0x208   :  { %v410_v54 = vpop.eup %409 }
 0x209   :  { %380 = vmatmul.mubr.msk.f32.vlgmr.msra.gmra.mrb[2].mxu0 %vm237_vm3, %v410_v54 }
 0x2dc   :  { %v307_v56 = vpop.f32.mrb[2].mxu0 }
 0x2dd   :  { %v308_v57 = vadd.f32 %v328_v55, %v307_v56  ;;  %v381_v58 = vpop.f32.mrb[3].mxu0 }
 0x2df   :  { %312 = vst.msk [vmem:[%s511_s2] sm:$0xff] %vm311_vm4, %v308_v57 }
 0x2e0   :  { %317 = vsyncpa [#allocation5], 1 }
 0x2e1   :  { %318 = vsyncmov [#allocation3] }
 0x2e4   :  { %s319_s5 = vpop.sfrf %318 }
 0x2e5   :  { %p330_p2 = scmp.ne.s32.totalorder %s319_s5, 0 }
 0x2e7   :  { %323 = shalt.err (%p330_p2)  }

</bundles_post_ra>
